<compile_context>
chip_gen: v7x
topology: tpu7x:2x2x1
jax: 0.10.0
libtpu: 0.0.40
codegen_flags: <defaults>
</compile_context>

<pallas_src>
import jax
import jax.numpy as jnp
from jax.experimental import pallas as pl
from jax.experimental.pallas import tpu as pltpu


def policy_net_kernel(x_ref, w1_ref, b1_ref, w2_ref, b2_ref, w3_ref, b3_ref, o_ref):
    # x_ref: (TB, 128) bf16 tile; weights bf16; biases f32; output f32 (TB, 128) lane-dense.
    x = x_ref[...]

    # Layer 1: Linear(128 -> 64) + ReLU   (bf16 MXU matmul, f32 accumulate + f32 elementwise)
    h1 = jnp.dot(x, w1_ref[...], preferred_element_type=jnp.float32) + b1_ref[...]
    h1 = jnp.maximum(h1, 0.0).astype(jnp.bfloat16)

    # Layer 2: Linear(64 -> 32) + ReLU
    h2 = jnp.dot(h1, w2_ref[...], preferred_element_type=jnp.float32) + b2_ref[...]
    h2 = jnp.maximum(h2, 0.0).astype(jnp.bfloat16)

    # Layer 3: Linear(32 -> 128 zero-padded) + Sigmoid
    z = jnp.dot(h2, w3_ref[...], preferred_element_type=jnp.float32) + b3_ref[...]
    # sigmoid(z) = 1 / (1 + exp(-z)): exp -> EUP, approx reciprocal -> stays off the VALU.
    o_ref[...] = pl.reciprocal(1.0 + jnp.exp(-z), approx=True).astype(o_ref.dtype)


def policy_network_forward(x, params, *, tile_b=2048):
    w1, b1, w2, b2, w3, b3 = params
    B, in_dim = x.shape
    out_dim = w3.shape[1]

    # Lane-dense output: pad the last layer to 128 output columns (zeros), slice after.
    OUT_PAD = 128
    w3p = jnp.zeros((w3.shape[0], OUT_PAD), jnp.float32).at[:, :out_dim].set(w3)
    b3p = jnp.zeros((1, OUT_PAD), jnp.float32).at[:, :out_dim].set(b3)

    # bf16 matmul operands; accumulation / elementwise remain f32 inside the kernel.
    xb = x.astype(jnp.bfloat16)
    w1b = w1.astype(jnp.bfloat16)
    w2b = w2.astype(jnp.bfloat16)
    w3b = w3p.astype(jnp.bfloat16)

    # Batch tiling: TB rows per grid step (multiple of 8 sublanes); pad B up to a multiple.
    TB = min(tile_b, max(8, ((B + 7) // 8) * 8))
    B_pad = ((B + TB - 1) // TB) * TB
    if B_pad != B:
        xb = jnp.pad(xb, ((0, B_pad - B), (0, 0)))

    def resident(shape):
        # Full-array block, constant index map -> stays in VMEM across all grid steps.
        return pl.BlockSpec(shape, lambda i: (0, 0))

    out = pl.pallas_call(
        policy_net_kernel,
        out_shape=jax.ShapeDtypeStruct((B_pad, OUT_PAD), jnp.float32),
        grid=(B_pad // TB,),
        in_specs=[
            pl.BlockSpec((TB, in_dim), lambda i: (i, 0)),   # x tile, pipelined over batch
            resident(w1b.shape), resident(b1.shape),
            resident(w2b.shape), resident(b2.shape),
            resident(w3b.shape), resident(b3p.shape),
        ],
        out_specs=pl.BlockSpec((TB, OUT_PAD), lambda i: (i, 0)),
        compiler_params=pltpu.CompilerParams(
            dimension_semantics=("parallel",),  # lets v7x shard batch tiles across its 2 TCs
        ),
    )(xb, w1b, b1, w2b, b2, w3b, b3p)

    return out[:B, :out_dim]


def init_params(key, input_dim=128, output_dim=2):
    """Deterministic PyTorch-style init (uniform(-1/sqrt(fan_in), 1/sqrt(fan_in)))."""
    dims = [(input_dim, 64), (64, 32), (32, output_dim)]
    params = []
    for (fan_in, fan_out) in dims:
        key, kw, kb = jax.random.split(key, 3)
        bound = 1.0 / (fan_in ** 0.5)
        w = jax.random.uniform(kw, (fan_in, fan_out), jnp.float32, -bound, bound)
        b = jax.random.uniform(kb, (1, fan_out), jnp.float32, -bound, bound)
        params += [w, b]
    return tuple(params)


def reference_forward(x, params):
    w1, b1, w2, b2, w3, b3 = params
    h1 = jnp.maximum(x @ w1 + b1, 0.0)
    h2 = jnp.maximum(h1 @ w2 + b2, 0.0)
    return jax.nn.sigmoid(h2 @ w3 + b3)


if __name__ == "__main__":
    key = jax.random.PRNGKey(0)
    kx, kp = jax.random.split(key)

    batch, input_dim, output_dim = 8, 128, 2
    x = jax.random.normal(kx, (batch, input_dim), jnp.float32)
    params = init_params(kp, input_dim=input_dim, output_dim=output_dim)

    out = policy_network_forward(x, params)
    out = jax.block_until_ready(out)

    ref = reference_forward(x, params)
    assert out.shape == (batch, output_dim), out.shape
    # bf16 matmul operands + approx reciprocal -> loosened tolerance vs f32 reference.
    assert jnp.allclose(out, ref, atol=3e-2, rtol=0), (
        "mismatch vs reference",
        float(jnp.max(jnp.abs(out - ref))),
    )

    print("KERNEL_OK")
</pallas_src>

<mosaic_0001>
module attributes {stable_mosaic.version = 11 : i64} {
  func.func @policy_net_kernel(%arg0: i32, %arg1: memref<8x128xbf16, #tpu.memory_space<vmem>>, %arg2: memref<128x64xbf16, #tpu.memory_space<vmem>>, %arg3: memref<1x64xf32, #tpu.memory_space<vmem>>, %arg4: memref<64x32xbf16, #tpu.memory_space<vmem>>, %arg5: memref<1x32xf32, #tpu.memory_space<vmem>>, %arg6: memref<32x128xbf16, #tpu.memory_space<vmem>>, %arg7: memref<1x128xf32, #tpu.memory_space<vmem>>, %arg8: memref<8x128xf32, #tpu.memory_space<vmem>>) attributes {dimension_semantics = [#tpu.dimension_semantics<parallel>], iteration_bounds = array<i64: 1>, scalar_prefetch = 0 : i64, scratch_operands = 0 : i64, tpu.core_type = #tpu.core_type<tc>, window_params = [{transform_indices = @transform_0, window_bounds = array<i64: 8, 128>}, {pipeline_mode = #tpu.pipeline_mode<synchronous>, transform_indices = @transform_1, window_bounds = array<i64: 128, 64>}, {pipeline_mode = #tpu.pipeline_mode<synchronous>, transform_indices = @transform_2, window_bounds = array<i64: 1, 64>}, {pipeline_mode = #tpu.pipeline_mode<synchronous>, transform_indices = @transform_3, window_bounds = array<i64: 64, 32>}, {pipeline_mode = #tpu.pipeline_mode<synchronous>, transform_indices = @transform_4, window_bounds = array<i64: 1, 32>}, {pipeline_mode = #tpu.pipeline_mode<synchronous>, transform_indices = @transform_5, window_bounds = array<i64: 32, 128>}, {pipeline_mode = #tpu.pipeline_mode<synchronous>, transform_indices = @transform_6, window_bounds = array<i64: 1, 128>}, {transform_indices = @transform_7, window_bounds = array<i64: 8, 128>}]} {
    %c0 = arith.constant 0 : index
    %c0_0 = arith.constant 0 : index
    %0 = vector.load %arg1[%c0, %c0_0] : memref<8x128xbf16, #tpu.memory_space<vmem>>, vector<8x128xbf16>
    %c0_1 = arith.constant 0 : index
    %c0_2 = arith.constant 0 : index
    %1 = vector.load %arg2[%c0_1, %c0_2] : memref<128x64xbf16, #tpu.memory_space<vmem>>, vector<128x64xbf16>
    %cst = arith.constant dense<0.000000e+00> : vector<8x64xf32>
    %2 = tpu.matmul %0, %1, %cst {dimension_numbers = #tpu.dot_dimension_numbers<[1], [0], [0], [1], [0, 0, 1, 1], [], []>} : vector<8x128xbf16>, vector<128x64xbf16>, vector<8x64xf32> -> vector<8x64xf32>
    %c0_3 = arith.constant 0 : index
    %c0_4 = arith.constant 0 : index
    %3 = vector.load %arg3[%c0_3, %c0_4] : memref<1x64xf32, #tpu.memory_space<vmem>>, vector<1x64xf32>
    %4 = vector.broadcast %3 : vector<1x64xf32> to vector<8x64xf32>
    %5 = arith.addf %2, %4 : vector<8x64xf32>
    %cst_5 = arith.constant 0.000000e+00 : f32
    %6 = vector.broadcast %cst_5 : f32 to vector<8x64xf32>
    %7 = arith.maximumf %5, %6 : vector<8x64xf32>
    %8 = arith.truncf %7 : vector<8x64xf32> to vector<8x64xbf16>
    %c0_6 = arith.constant 0 : index
    %c0_7 = arith.constant 0 : index
    %9 = vector.load %arg4[%c0_6, %c0_7] : memref<64x32xbf16, #tpu.memory_space<vmem>>, vector<64x32xbf16>
    %cst_8 = arith.constant dense<0.000000e+00> : vector<8x32xf32>
    %10 = tpu.matmul %8, %9, %cst_8 {dimension_numbers = #tpu.dot_dimension_numbers<[1], [0], [0], [1], [0, 0, 1, 1], [], []>} : vector<8x64xbf16>, vector<64x32xbf16>, vector<8x32xf32> -> vector<8x32xf32>
    %c0_9 = arith.constant 0 : index
    %c0_10 = arith.constant 0 : index
    %11 = vector.load %arg5[%c0_9, %c0_10] : memref<1x32xf32, #tpu.memory_space<vmem>>, vector<1x32xf32>
    %12 = vector.broadcast %11 : vector<1x32xf32> to vector<8x32xf32>
    %13 = arith.addf %10, %12 : vector<8x32xf32>
    %cst_11 = arith.constant 0.000000e+00 : f32
    %14 = vector.broadcast %cst_11 : f32 to vector<8x32xf32>
    %15 = arith.maximumf %13, %14 : vector<8x32xf32>
    %16 = arith.truncf %15 : vector<8x32xf32> to vector<8x32xbf16>
    %c0_12 = arith.constant 0 : index
    %c0_13 = arith.constant 0 : index
    %17 = vector.load %arg6[%c0_12, %c0_13] : memref<32x128xbf16, #tpu.memory_space<vmem>>, vector<32x128xbf16>
    %cst_14 = arith.constant dense<0.000000e+00> : vector<8x128xf32>
    %18 = tpu.matmul %16, %17, %cst_14 {dimension_numbers = #tpu.dot_dimension_numbers<[1], [0], [0], [1], [0, 0, 1, 1], [], []>} : vector<8x32xbf16>, vector<32x128xbf16>, vector<8x128xf32> -> vector<8x128xf32>
    %c0_15 = arith.constant 0 : index
    %c0_16 = arith.constant 0 : index
    %19 = vector.load %arg7[%c0_15, %c0_16] : memref<1x128xf32, #tpu.memory_space<vmem>>, vector<1x128xf32>
    %20 = vector.broadcast %19 : vector<1x128xf32> to vector<8x128xf32>
    %21 = arith.addf %18, %20 : vector<8x128xf32>
    %cst_17 = arith.constant 0.000000e+00 : f32
    %22 = vector.broadcast %cst_17 : f32 to vector<8x128xf32>
    %23 = arith.subf %22, %21 : vector<8x128xf32>
    %24 = math.exp %23 : vector<8x128xf32>
    %cst_18 = arith.constant 1.000000e+00 : f32
    %25 = vector.broadcast %cst_18 : f32 to vector<8x128xf32>
    %26 = arith.addf %25, %24 : vector<8x128xf32>
    %27 = tpu.reciprocal %26 {approx = true} : vector<8x128xf32> -> vector<8x128xf32>
    %c0_19 = arith.constant 0 : index
    %c0_20 = arith.constant 0 : index
    %28 = vector.load %arg8[%c0_19, %c0_20] : memref<8x128xf32, #tpu.memory_space<vmem>>, vector<8x128xf32>
    tpu.vector_store %arg8[%c0_19, %c0_20], %27 {strides = array<i32>} : memref<8x128xf32, #tpu.memory_space<vmem>>, vector<8x128xf32>,
    return
  }
  func.func @transform_0(%arg0: i32) -> (i32, i32) {
    %c0_i32 = arith.constant 0 : i32
    %c0_i32_0 = arith.constant 0 : i32
    return %arg0, %c0_i32 : i32, i32
  }
  func.func @transform_1(%arg0: i32) -> (i32, i32) {
    %c0_i32 = arith.constant 0 : i32
    %c0_i32_0 = arith.constant 0 : i32
    %c0_i32_1 = arith.constant 0 : i32
    return %c0_i32, %c0_i32_0 : i32, i32
  }
  func.func @transform_2(%arg0: i32) -> (i32, i32) {
    %c0_i32 = arith.constant 0 : i32
    %c0_i32_0 = arith.constant 0 : i32
    %c0_i32_1 = arith.constant 0 : i32
    return %c0_i32, %c0_i32_0 : i32, i32
  }
  func.func @transform_3(%arg0: i32) -> (i32, i32) {
    %c0_i32 = arith.constant 0 : i32
    %c0_i32_0 = arith.constant 0 : i32
    %c0_i32_1 = arith.constant 0 : i32
    return %c0_i32, %c0_i32_0 : i32, i32
  }
  func.func @transform_4(%arg0: i32) -> (i32, i32) {
    %c0_i32 = arith.constant 0 : i32
    %c0_i32_0 = arith.constant 0 : i32
    %c0_i32_1 = arith.constant 0 : i32
    return %c0_i32, %c0_i32_0 : i32, i32
  }
  func.func @transform_5(%arg0: i32) -> (i32, i32) {
    %c0_i32 = arith.constant 0 : i32
    %c0_i32_0 = arith.constant 0 : i32
    %c0_i32_1 = arith.constant 0 : i32
    return %c0_i32, %c0_i32_0 : i32, i32
  }
  func.func @transform_6(%arg0: i32) -> (i32, i32) {
    %c0_i32 = arith.constant 0 : i32
    %c0_i32_0 = arith.constant 0 : i32
    %c0_i32_1 = arith.constant 0 : i32
    return %c0_i32, %c0_i32_0 : i32, i32
  }
  func.func @transform_7(%arg0: i32) -> (i32, i32) {
    %c0_i32 = arith.constant 0 : i32
    %c0_i32_0 = arith.constant 0 : i32
    return %arg0, %c0_i32 : i32, i32
  }
}

</mosaic_0001>

<bundles_post_ra>
// kernel: tpu_custom_call.1
= control target key start
LH: loop header
LB: loop body
LE: loop exit
PB: predicated region body
PF: predicated region fallthrough
CT: control target
= control target key end

     0   :  { %v435_v1 = vmov 0.0   ;;  %vm436_vm0 = vmmov 0   ;;  %s547_s0 = inlined_call_operand.vmem [shape: bf16[8,128], index: 0, kind: input, shape index: {}]   ;;  %s548_s1 = inlined_call_operand.vmem [shape: bf16[128,64], index: 1, kind: input, shape index: {}]   ;;  %s549_s2 = inlined_call_operand.vmem [shape: f32[1,64], index: 2, kind: input, shape index: {}]   ;;  %s550_s3 = inlined_call_operand.vmem [shape: bf16[64,32], index: 3, kind: input, shape index: {}]   ;;  %s551_s4 = inlined_call_operand.vmem [shape: f32[1,32], index: 4, kind: input, shape index: {}]   ;;  %s552_s5 = inlined_call_operand.vmem [shape: bf16[32,128], index: 5, kind: input, shape index: {}]   ;;  %s553_s6 = inlined_call_operand.vmem [shape: f32[1,128], index: 6, kind: input, shape index: {}]   ;;  %s554_s7 = inlined_call_operand.hbm [shape: f32[8,128], index: 7, kind: output, shape index: {}]  }
   0x1   :  { %v393_v0 = vld [vmem:[%s548_s1] sm:$0xff]   ;;  %350 = vmatprep.subr.bf16.mxu0 %v435_v1  ;;  %370 = vmatprep.subr.bf16.mxu1 %v435_v1  ;;  %v394_v2 = vld [vmem:[%s548_s1 + $0x8] sm:$0xff]   ;;  %v395_v3 = vld [vmem:[%s548_s1 + $0x10] sm:$0xff]  }
   0x2   :  { %351 = vmatpush3.bf16.msra.mxu0 %v393_v0  ;;  %366 = vmatprep.mubr.msk.bf16.mxu0 %vm436_vm0, %v435_v1  ;;  %v401_v4 = vld [vmem:[%s550_s3] sm:$0xff]   ;;  %v396_v5 = vld [vmem:[%s548_s1 + $0x18] sm:$0xff]   ;;  %v402_v6 = vld [vmem:[%s550_s3 + $0x8] sm:$0xff]  }
   0x3   :  { %352 = vmatprep.subr.bf16.mxu0 %v435_v1  ;;  %378 = vmatprep.mubr.msk.bf16.mxu1 %vm436_vm0, %v435_v1 }
   0x4   :  { %371 = vmatpush3.bf16.msra.mxu1 %v401_v4 }
   0x5   :  { %372 = vmatprep.subr.bf16.mxu1 %v435_v1 }
   0x6   :  { %353 = vmatpush3.bf16.msra.mxu0 %v394_v2 }
   0x7   :  { %354 = vmatprep.subr.bf16.mxu0 %v435_v1 }
   0xa   :  { %355 = vmatpush3.bf16.msra.mxu0 %v395_v3 }
   0xb   :  { %356 = vmatprep.subr.bf16.mxu0 %v435_v1 }
   0xc   :  { %12 = vsyncpa [#allocation3], 0  ;;  %v397_v7 = vld [vmem:[%s548_s1 + $0x20] sm:$0xff]   ;;  %373 = vmatpush3.bf16.msra.mxu1 %v402_v6  ;;  %v398_v8 = vld [vmem:[%s548_s1 + $0x28] sm:$0xff]   ;;  %vm181_vm1 = vcmask 523264   ;;  %vm250_vm2 = vcmask 261120  }
   0xd   :  { %374 = vmatprep.subr.bf16.mxu1 %v435_v1  ;;  %v399_v9 = vld [vmem:[%s548_s1 + $0x30] sm:$0xff]   ;;  %v400_v10 = vld [vmem:[%s548_s1 + $0x38] sm:$0xff]   ;;  %v28_v11 = vld [vmem:[%s547_s0] sm:$0xf] }
   0xe   :  { %357 = vmatpush3.bf16.msra.mxu0 %v396_v5  ;;  %v403_v12 = vld [vmem:[%s550_s3 + $0x10] sm:$0xff]   ;;  %v404_v13 = vld [vmem:[%s550_s3 + $0x18] sm:$0xff]   ;;  %v314_v14 = vld [vmem:[%s549_s2] ss:$0 sm:$0xff] }
   0xf   :  { %358 = vmatprep.subr.bf16.mxu0 %v435_v1  ;;  %v405_v21 = vld [vmem:[%s552_s5] sm:$0xff]   ;;  %v406_v23 = vld [vmem:[%s552_s5 + $0x8] sm:$0xff]  }
  0x10   :  { %375 = vmatpush3.bf16.msra.mxu1 %v403_v12  ;;  %v323_v24 = vld [vmem:[%s551_s4] ss:$0 sm:$0xff]  ;;  %s437_s4 = smov [#allocation2]  }
  0x11   :  { %376 = vmatprep.subr.bf16.mxu1 %v435_v1  ;;  %v329_v32 = vld [vmem:[%s553_s6] ss:$0 sm:$0xff]  ;;  %s306_s5 = sshll.u32 %s437_s4, 4  ;;  %s307_s5 = int_to_ptr.vmem [resolvable:$true] %s306_s5 }
  0x12   :  { %359 = vmatpush3.bf16.msra.mxu0 %v397_v7  ;;  %s411_s10 = scalar_lea.vmem %s307_s5, 128  ;;  %p416_p1 = scmp.lt.s32.totalorder %s307_s5, %s307_s5 }
  0x13   :  { %360 = vmatprep.subr.bf16.mxu0 %v435_v1  ;;  %p412_p0 = scmp.ne.s32.totalorder %s307_s5, %s411_s10  ;;  %p417_p2 = scmp.lt.s32.totalorder %s411_s10, %s411_s10 }
  0x14   :  { %377 = vmatpush3.bf16.msra.mxu1 %v404_v13 }
  0x15   :  { %382 = vmatprep.subr.bf16.mxu1 %v435_v1  ;;  %p418_p3 = por %p417_p2, %p416_p1 }
  0x16   :  { %361 = vmatpush3.bf16.msra.mxu0 %v398_v8 }
  0x17   :  { %362 = vmatprep.subr.bf16.mxu0 %v435_v1  ;;  %p419_p4 = pnand %p418_p3, %p412_p0 }
  0x1a   :  { %363 = vmatpush3.bf16.msra.mxu0 %v399_v9 }
  0x1b   :  { %364 = vmatprep.subr.bf16.mxu0 %v435_v1 }
  0x1e   :  { %365 = vmatpush3.bf16.msra.mxu0 %v400_v10 }
  0x21   :  { %367 = vmatmul.mubr.bf16.vlgmr.msra.gmra.mrb[0].mxu0 %v28_v11 }
  0xf4   :  { %v134_v15 = vpop.f32.mrb[0].mxu0 }
  0xf5   :  { %v135_v16 = vadd.f32 %v314_v14, %v134_v15  ;;  %v368_v17 = vpop.f32.mrb[1].mxu0 }
  0xf6   :  { %v137_v18 = vpop.f32.mrb[2].mxu0 }
  0xf7   :  { %v140_v19 = vmax.f32 %v135_v16, 0.0  ;;  %v369_v20 = vpop.f32.mrb[3].mxu0 }
  0xf9   :  { %v141_v22 = vpack.c.bf16 %v140_v19, %v140_v19 }
  0xfb   :  { %379 = vmatmul.mubr.msk.bf16.vlgmr.msra.gmra.mrb[0].mxu1 %vm181_vm1, %v141_v22 }
  0xfc   :  { %383 = vmatpush3.bf16.msra.mxu1 %v405_v21  ;;  %386 = vmatprep.mubr.msk.bf16.mxu1 %vm436_vm0, %v435_v1 }
  0xfd   :  { %384 = vmatprep.subr.bf16.mxu1 %v435_v1 }
 0x100   :  { %385 = vmatpush3.bf16.msra.mxu1 %v406_v23 }
 0x1ce   :  { %v219_v25 = vpop.f32.mrb[0].mxu1 }
 0x1cf   :  { %v220_v26 = vadd.f32 %v323_v24, %v219_v25  ;;  %v380_v27 = vpop.f32.mrb[1].mxu1 }
 0x1d0   :  { %v222_v28 = vpop.f32.mrb[2].mxu1 }
 0x1d1   :  { %v225_v29 = vmax.f32 %v220_v26, 0.0  ;;  %v381_v30 = vpop.f32.mrb[3].mxu1 }
 0x1d3   :  { %v226_v31 = vpack.c.bf16 %v225_v29, %v225_v29 }
 0x1d5   :  { %387 = vmatmul.mubr.msk.bf16.vlgmr.msra.gmra.mrb[4].mxu1 %vm250_vm2, %v226_v31 }
 0x2a8   :  { %v288_v33 = vpop.f32.mrb[4].mxu1 }
 0x2a9   :  { %v289_v34 = vadd.f32 %v329_v32, %v288_v33  ;;  %v388_v35 = vpop.f32.mrb[5].mxu1 }
 0x2aa   :  { %v291_v36 = vpop.f32.mrb[6].mxu1 }
 0x2ab   :  { %v294_v37 = vsub.f32 0.0, %v289_v34  ;;  %v389_v38 = vpop.f32.mrb[7].mxu1 }
 0x2ad   :  { %v295_v39 = vmul.f32 1.442695, %v294_v37 }
 0x2af   :  { %407 = vpow2.f32 %v295_v39 }
 0x2b9   :  { %v408_v40 = vpop.eup %407 }
 0x2ba   :  { %v297_v41 = vadd.f32 1.0, %v408_v40 }
 0x2bc   :  { %409 = vrcp.f32 %v297_v41 }
 0x2c6   :  { %v410_v42 = vpop.eup %409 }
 0x2c7   :  { %299 = vst [vmem:[#allocation2] sm:$0xff] %v410_v42 }
 0x2c8   :  { %422 = shalt.err (!%p419_p4)
}
 0x2c9   :  { %s423_s12 = scalar_lea.hbm %s554_s7, 128 }
 0x2ca   :  { %p424_p5 = scmp.ne.s32.totalorder %s554_s7, %s423_s12  ;;  %p427_p6 = scmp.lt.u32.totalorder %s423_s12, %s554_s7 }
 0x2cc   :  { %p429_p7 = pnand %p427_p6, %p424_p5 }
 0x2ce   :  { %432 = shalt.err (!%p429_p7)
}
 0x2cf   :  { %309 = dma.vmem_to_hbm [thread:$0]  %s307_s5, 128, %s554_s7, [#allocation3]  }
 0x2d0   :  { %433 = dma.done.wait [#allocation3], 128  }
 0x2d1   :  { %434 = vsyncadd [#allocation3], 4294967168 }
 0x2d2   :  { %313 = vsyncpa [#allocation3], 1 }

</bundles_post_ra>
